<compile_context>
chip_gen: v5e
topology: v5e:2x2
jax: 0.10.0
libtpu: 0.0.40
codegen_flags: <defaults>
</compile_context>

<pallas_src>
import jax
import jax.numpy as jnp
from jax.experimental import pallas as pl
from jax.experimental.pallas import tpu as pltpu

HIDDEN = 512  # fixed attention dim of the module


def attention_kernel(img_ref, Ww_ref, u_ref, ww_ref, out_ref, We_ref):
    """One grid step = (image tile b, hidden row j).

    img_ref : (TB, P, E)  image-feature tile (constant across the j axis), f32
    Ww_ref  : (E, H)      W.weight^T, bf16 (grid-invariant)
    u_ref   : (Bh, 1, H)  U(hidden) + U.bias + W.bias, f32 (grid-invariant)
    ww_ref  : (1, H)      w.weight, f32 (grid-invariant)
    out_ref : (1, TB, E)  phi[j, b-tile], f32
    We_ref  : (TB, P, H)  VMEM scratch with W_e for the current img tile
                          (bf16 on v6e/v7x, f32 on v5e and older)
    """
    TB, P, E = img_ref.shape
    H = Ww_ref.shape[1]
    cdt = We_ref.dtype                      # elementwise compute dtype
    HC = 128 if (H % 128 == 0 and H > 128) else H
    j = pl.program_id(1)

    # ---- hoisted, hidden-independent: W_e = img @ W^T (bf16 MXU) ---------
    # Recomputed only when the image tile changes (j == 0 of each b tile).
    # Row-by-row 2-D dots over the untiled leading axis: no (TB*P, E)
    # reshape (would relayout when P % 8 != 0) and only a (P, H) f32
    # transient lives at a time before being cast into the scratch.
    @pl.when(j == 0)
    def _():
        Ww = Ww_ref[...]                                    # (E, H) bf16

        def one_row(b):
            we_b = jnp.dot(img_ref[b].astype(jnp.bfloat16), Ww,
                           preferred_element_type=jnp.float32)
            We_ref[b] = we_b.astype(cdt)

        if TB <= 64:
            for b in range(TB):                             # unrolled
                one_row(b)
        else:
            @pl.loop(0, TB)
            def _(b):
                one_row(b)

    # ---- per-hidden-row phase, chunked over H (lane-aligned 128 slabs) ----
    u = u_ref[j].astype(cdt)                # (1, H)  (bias already folded in)
    wv = ww_ref[...].astype(cdt)            # (1, H)

    e = jnp.zeros((TB, P), jnp.float32)
    for h0 in range(0, H, HC):
        u_c = u[:, h0:h0 + HC][None]                        # (1, 1, HC)
        w_c = wv[:, h0:h0 + HC][None]                       # (1, 1, HC)
        att_c = jnp.tanh(We_ref[:, :, h0:h0 + HC] + u_c)    # (TB, P, HC)
        prod = att_c * w_c
        e = e + jnp.sum(prod.astype(jnp.float32), axis=-1)  # (TB, P) f32

    # softmax over pixels; divide folded into the phi scaling (one reciprocal
    # per image row, alpha never materialized).  w.bias dropped: softmax is
    # shift-invariant.
    e_max = jnp.max(e, axis=-1, keepdims=True)
    p = jnp.exp(e - e_max)                                   # (TB, P) f32
    inv = pl.reciprocal(jnp.sum(p, axis=-1, keepdims=True))  # (TB, 1)

    # phi[b, :] = sum_p alpha[b, p] * img[b, p, :] as a batched MXU
    # contraction -> no (TB, P, E) broadcast intermediate.
    phi = jnp.einsum('bqp,bpe->bqe', p[:, None, :], img_ref[...],
                     preferred_element_type=jnp.float32)[:, 0, :]   # (TB, E)
    out_ref[0] = (phi * inv).astype(out_ref.dtype)


def _hw_config():
    """(elementwise dtype, picker VMEM budget, vmem_limit_bytes, 2-TC chip)."""
    kind = ""
    try:
        kind = jax.devices()[0].device_kind.lower()
    except Exception:
        pass
    # v5e and older: no bf16 VPU/EUP -> keep elementwise math in f32.
    legacy = any(t in kind for t in ("v2", "v3", "v4", "v5"))
    compute_dtype = jnp.float32 if legacy else jnp.bfloat16

    cap = None
    try:
        cap = int(pltpu.get_tpu_info().vmem_capacity_bytes)
    except Exception:
        cap = None
    if not cap:
        cap = (64 if "7" in kind else 128) * 1024 * 1024     # v7x: 64 MiB
    budget = int(cap * 0.55)                                 # tile-picker plan
    limit = min(int(cap * 0.85), cap - 16 * 1024 * 1024,     # compiler limit,
                96 * 1024 * 1024)                            # with headroom
    multi_core = "7" in kind                                 # v7x: 2 TCs/chip
    return compute_dtype, budget, limit, multi_core


def _pick_image_tile(B, P, E, H, Bh, we_bytes, budget_bytes, want_split):
    """Largest legal image-batch tile TB whose per-step working set fits.

    Legal: TB == B, or TB % 8 == 0 and B % TB == 0 (the (1, TB, E) output
    block then satisfies the (8,128) rule and the grid divides evenly).
    Accounting includes the in-kernel chunked intermediates.  On 2-TC chips
    prefer >= 2 image tiles so the "parallel" axis spans both cores.
    """
    HC = 128 if (H % 128 == 0 and H > 128) else H
    fixed = (2 * E * H * 2            # W weights, bf16, double-buffered
             + 2 * Bh * 8 * H * 4     # U_all (grid-invariant, sublane-padded)
             + 2 * 8 * H * 4)         # w weights

    def fits(tb):
        ws = (2 * tb * P * E * 4              # img tile (double-buffered f32)
              + tb * P * H * we_bytes         # W_e scratch
              + 2 * tb * E * 4                # output tile (double-buffered)
              + P * H * 4                     # per-row matmul f32 transient
              + tb * P * HC * (we_bytes + 4)  # chunked tanh / product temps
              + 6 * tb * P * 4)               # e / p / softmax temporaries
        return fixed + ws <= budget_bytes

    cands = [B] + [tb for tb in range(8, B, 8) if B % tb == 0]

    def prefer_split(c):
        if want_split:
            c2 = [tb for tb in c if B // tb >= 2]
            if c2:
                return c2
        return c

    fitting = prefer_split([tb for tb in cands if fits(tb)])
    if fitting:
        return max(fitting)
    return min(prefer_split(cands))   # nothing fits: smallest legal tile


@jax.jit
def attention_forward(img_features, hidden_state, params):
    """Pallas implementation of Attention.forward."""
    Uw, Ub, Ww, Wb, ww, wb = params  # wb unused: softmax is shift-invariant
    B, P, E = img_features.shape
    L, Bh, E2 = hidden_state.shape
    assert L == 1 and E2 == E, "PyTorch broadcast requires num_layers == 1"
    H = Ww.shape[0]

    compute_dtype, budget, vmem_limit, multi_core = _hw_config()

    # Batched U projection (one (Bh,E)x(E,H) matmul) with W.bias folded in:
    #   tanh(img@Ww^T + Wb + hidden@Uw^T + Ub) == tanh(We' + u_j)
    U_all = (hidden_state[0].astype(jnp.float32) @ Uw.T + Ub + Wb)
    U_all = U_all.reshape(Bh, 1, H)

    Ww_t = Ww.T.astype(jnp.bfloat16)              # (E, H) bf16 MXU operand
    ww_r = ww.reshape(1, H)

    we_bytes = 2 if compute_dtype == jnp.bfloat16 else 4
    tb = _pick_image_tile(B, P, E, H, Bh, we_bytes, budget, multi_core)
    grid = (B // tb, Bh)   # image tiles outer (parallel), hidden rows inner

    return pl.pallas_call(
        attention_kernel,
        out_shape=jax.ShapeDtypeStruct((Bh, B, E), jnp.float32),
        grid=grid,
        in_specs=[
            pl.BlockSpec((tb, P, E), lambda b, j: (b, 0, 0)),     # img tile
            pl.BlockSpec((E, H),     lambda b, j: (0, 0)),        # W^T (bf16)
            pl.BlockSpec((Bh, 1, H), lambda b, j: (0, 0, 0)),     # U_all (resident)
            pl.BlockSpec((1, H),     lambda b, j: (0, 0)),        # w.weight
        ],
        out_specs=pl.BlockSpec((1, tb, E), lambda b, j: (j, b, 0)),
        scratch_shapes=[pltpu.VMEM((tb, P, H), compute_dtype)],
        compiler_params=pltpu.CompilerParams(
            dimension_semantics=("parallel", "arbitrary"),
            vmem_limit_bytes=vmem_limit),
    )(img_features, Ww_t, U_all, ww_r)


def attention_ref(img_features, hidden_state, params):
    """Pure-JAX literal transcription of the PyTorch forward (for checking)."""
    Uw, Ub, Ww, Wb, ww, wb = params
    W_e = img_features @ Ww.T + Wb                     # (B, P, H)
    U_e = hidden_state @ Uw.T + Ub                     # (1, Bh, H)
    U_e = jnp.transpose(U_e[None], (2, 0, 1, 3))       # (Bh, 1, 1, H)
    att = jnp.tanh(W_e + U_e)                          # (Bh, B, P, H)
    e = (att @ ww.T + wb)[..., 0]                      # (Bh, B, P)
    alpha = jax.nn.softmax(e, axis=-1)
    phi = (img_features * alpha[..., None]).sum(2)     # (Bh, B, E)
    return phi


def init_params(key, encoder_dim):
    """Deterministic PyTorch-Linear-style init (uniform +/- 1/sqrt(fan_in))."""
    ks = jax.random.split(key, 6)

    def lin(kw, kb, fan_in, fan_out):
        bound = 1.0 / jnp.sqrt(fan_in)
        w = jax.random.uniform(kw, (fan_out, fan_in), jnp.float32, -bound, bound)
        b = jax.random.uniform(kb, (fan_out,), jnp.float32, -bound, bound)
        return w, b

    Uw, Ub = lin(ks[0], ks[1], encoder_dim, HIDDEN)   # self.U
    Ww, Wb = lin(ks[2], ks[3], encoder_dim, HIDDEN)   # self.W
    ww, wb = lin(ks[4], ks[5], HIDDEN, 1)             # self.w
    return (Uw, Ub, Ww, Wb, ww, wb)


if __name__ == "__main__":
    key = jax.random.PRNGKey(0)
    k_img, k_hid, k_par = jax.random.split(key, 3)

    B, P, E = 2, 16, 32          # img batch, num pixels, encoder_dim
    Bh = 2                       # hidden-state batch (num_layers = 1)

    img_features = jax.random.normal(k_img, (B, P, E), jnp.float32)
    hidden_state = jax.random.normal(k_hid, (1, Bh, E), jnp.float32)
    params = init_params(k_par, E)

    phi = attention_forward(img_features, hidden_state, params)
    phi = jax.block_until_ready(phi)

    phi_ref = attention_ref(img_features, hidden_state, params)
    assert phi.shape == (Bh, B, E)
    # Tolerance loosened for the bf16 MXU matmul / bf16 tanh path (per review).
    assert jnp.allclose(phi, phi_ref, atol=2e-2, rtol=2e-2), (
        "mismatch vs reference")

    print("KERNEL_OK")
</pallas_src>

<mosaic_0001>
module attributes {stable_mosaic.version = 11 : i64} {
  func.func @attention_kernel(%arg0: i32, %arg1: i32, %arg2: memref<2x16x32xf32, #tpu.memory_space<vmem>>, %arg3: memref<32x512xbf16, #tpu.memory_space<vmem>>, %arg4: memref<2x1x512xf32, #tpu.memory_space<vmem>>, %arg5: memref<1x512xf32, #tpu.memory_space<vmem>>, %arg6: memref<1x2x32xf32, #tpu.memory_space<vmem>>, %arg7: memref<2x16x512xbf16, #tpu.memory_space<vmem>>) attributes {dimension_semantics = [#tpu.dimension_semantics<parallel>, #tpu.dimension_semantics<arbitrary>], iteration_bounds = array<i64: 1, 2>, scalar_prefetch = 0 : i64, scratch_operands = 1 : i64, tpu.core_type = #tpu.core_type<tc>, window_params = [{transform_indices = @transform_0, window_bounds = array<i64: 2, 16, 32>}, {pipeline_mode = #tpu.pipeline_mode<synchronous>, transform_indices = @transform_1, window_bounds = array<i64: 32, 512>}, {pipeline_mode = #tpu.pipeline_mode<synchronous>, transform_indices = @transform_2, window_bounds = array<i64: 2, 1, 512>}, {pipeline_mode = #tpu.pipeline_mode<synchronous>, transform_indices = @transform_3, window_bounds = array<i64: 1, 512>}, {transform_indices = @transform_4, window_bounds = array<i64: 1, 2, 32>}]} {
    %c0_i32 = arith.constant 0 : i32
    %0 = arith.cmpi eq, %arg1, %c0_i32 : i32
    %1 = arith.extui %0 : i1 to i32
    %c0_i32_0 = arith.constant 0 : i32
    %2 = arith.cmpi ne, %1, %c0_i32_0 : i32
    scf.if %2 {
      %c0_26 = arith.constant 0 : index
      %c0_27 = arith.constant 0 : index
      %79 = vector.load %arg3[%c0_26, %c0_27] : memref<32x512xbf16, #tpu.memory_space<vmem>>, vector<32x512xbf16>
      %c0_28 = arith.constant 0 : index
      %c0_29 = arith.constant 0 : index
      %c0_30 = arith.constant 0 : index
      %80 = vector.load %arg2[%c0_28, %c0_29, %c0_30] : memref<2x16x32xf32, #tpu.memory_space<vmem>>, vector<1x16x32xf32>
      %81 = vector.shape_cast %80 : vector<1x16x32xf32> to vector<16x32xf32>
      %82 = arith.truncf %81 : vector<16x32xf32> to vector<16x32xbf16>
      %cst_31 = arith.constant dense<0.000000e+00> : vector<16x512xf32>
      %83 = tpu.matmul %82, %79, %cst_31 {dimension_numbers = #tpu.dot_dimension_numbers<[1], [0], [0], [1], [0, 0, 1, 1], [], []>} : vector<16x32xbf16>, vector<32x512xbf16>, vector<16x512xf32> -> vector<16x512xf32>
      %84 = arith.truncf %83 : vector<16x512xf32> to vector<16x512xbf16>
      %c0_32 = arith.constant 0 : index
      %c0_33 = arith.constant 0 : index
      %c0_34 = arith.constant 0 : index
      %85 = vector.load %arg7[%c0_32, %c0_33, %c0_34] : memref<2x16x512xbf16, #tpu.memory_space<vmem>>, vector<1x16x512xbf16>
      %86 = vector.shape_cast %85 : vector<1x16x512xbf16> to vector<16x512xbf16>
      %87 = vector.shape_cast %84 : vector<16x512xbf16> to vector<1x16x512xbf16>
      tpu.vector_store %arg7[%c0_32, %c0_33, %c0_34], %87 {strides = array<i32>} : memref<2x16x512xbf16, #tpu.memory_space<vmem>>, vector<1x16x512xbf16>,
      %c1 = arith.constant 1 : index
      %c0_35 = arith.constant 0 : index
      %c0_36 = arith.constant 0 : index
      %88 = vector.load %arg2[%c1, %c0_35, %c0_36] : memref<2x16x32xf32, #tpu.memory_space<vmem>>, vector<1x16x32xf32>
      %89 = vector.shape_cast %88 : vector<1x16x32xf32> to vector<16x32xf32>
      %90 = arith.truncf %89 : vector<16x32xf32> to vector<16x32xbf16>
      %cst_37 = arith.constant dense<0.000000e+00> : vector<16x512xf32>
      %91 = tpu.matmul %90, %79, %cst_37 {dimension_numbers = #tpu.dot_dimension_numbers<[1], [0], [0], [1], [0, 0, 1, 1], [], []>} : vector<16x32xbf16>, vector<32x512xbf16>, vector<16x512xf32> -> vector<16x512xf32>
      %92 = arith.truncf %91 : vector<16x512xf32> to vector<16x512xbf16>
      %c1_38 = arith.constant 1 : index
      %c0_39 = arith.constant 0 : index
      %c0_40 = arith.constant 0 : index
      %93 = vector.load %arg7[%c1_38, %c0_39, %c0_40] : memref<2x16x512xbf16, #tpu.memory_space<vmem>>, vector<1x16x512xbf16>
      %94 = vector.shape_cast %93 : vector<1x16x512xbf16> to vector<16x512xbf16>
      %95 = vector.shape_cast %92 : vector<16x512xbf16> to vector<1x16x512xbf16>
      tpu.vector_store %arg7[%c1_38, %c0_39, %c0_40], %95 {strides = array<i32>} : memref<2x16x512xbf16, #tpu.memory_space<vmem>>, vector<1x16x512xbf16>,
    } else {
    }
    %3 = arith.index_cast %arg1 : i32 to index
    %c0 = arith.constant 0 : index
    %c0_1 = arith.constant 0 : index
    %4 = vector.load %arg4[%3, %c0, %c0_1] : memref<2x1x512xf32, #tpu.memory_space<vmem>>, vector<1x1x512xf32>
    %5 = vector.shape_cast %4 : vector<1x1x512xf32> to vector<1x512xf32>
    %6 = arith.truncf %5 : vector<1x512xf32> to vector<1x512xbf16>
    %c0_2 = arith.constant 0 : index
    %c0_3 = arith.constant 0 : index
    %7 = vector.load %arg5[%c0_2, %c0_3] : memref<1x512xf32, #tpu.memory_space<vmem>>, vector<1x512xf32>
    %8 = arith.truncf %7 : vector<1x512xf32> to vector<1x512xbf16>
    %cst = arith.constant 0.000000e+00 : f32
    %9 = vector.broadcast %cst : f32 to vector<2x16xf32>
    %10 = vector.extract_strided_slice %6 {offsets = [0, 0], sizes = [1, 128], strides = [1, 1]} : vector<1x512xbf16> to vector<1x128xbf16>
    %11 = vector.shape_cast %10 : vector<1x128xbf16> to vector<1x1x128xbf16>
    %12 = vector.extract_strided_slice %8 {offsets = [0, 0], sizes = [1, 128], strides = [1, 1]} : vector<1x512xbf16> to vector<1x128xbf16>
    %13 = vector.shape_cast %12 : vector<1x128xbf16> to vector<1x1x128xbf16>
    %c0_4 = arith.constant 0 : index
    %c0_5 = arith.constant 0 : index
    %c0_6 = arith.constant 0 : index
    %14 = vector.load %arg7[%c0_4, %c0_5, %c0_6] : memref<2x16x512xbf16, #tpu.memory_space<vmem>>, vector<2x16x128xbf16>
    %15 = vector.broadcast %11 : vector<1x1x128xbf16> to vector<2x16x128xbf16>
    %16 = arith.addf %14, %15 : vector<2x16x128xbf16>
    %17 = math.tanh %16 : vector<2x16x128xbf16>
    %18 = vector.broadcast %13 : vector<1x1x128xbf16> to vector<2x16x128xbf16>
    %19 = arith.mulf %17, %18 : vector<2x16x128xbf16>
    %20 = arith.extf %19 : vector<2x16x128xbf16> to vector<2x16x128xf32>
    %cst_7 = arith.constant dense<0.000000e+00> : vector<2x16xf32>
    %21 = vector.multi_reduction <add>, %20, %cst_7 [2] : vector<2x16x128xf32> to vector<2x16xf32>
    %22 = arith.addf %9, %21 : vector<2x16xf32>
    %23 = vector.extract_strided_slice %6 {offsets = [0, 128], sizes = [1, 128], strides = [1, 1]} : vector<1x512xbf16> to vector<1x128xbf16>
    %24 = vector.shape_cast %23 : vector<1x128xbf16> to vector<1x1x128xbf16>
    %25 = vector.extract_strided_slice %8 {offsets = [0, 128], sizes = [1, 128], strides = [1, 1]} : vector<1x512xbf16> to vector<1x128xbf16>
    %26 = vector.shape_cast %25 : vector<1x128xbf16> to vector<1x1x128xbf16>
    %c0_8 = arith.constant 0 : index
    %c0_9 = arith.constant 0 : index
    %c128 = arith.constant 128 : index
    %27 = vector.load %arg7[%c0_8, %c0_9, %c128] : memref<2x16x512xbf16, #tpu.memory_space<vmem>>, vector<2x16x128xbf16>
    %28 = vector.broadcast %24 : vector<1x1x128xbf16> to vector<2x16x128xbf16>
    %29 = arith.addf %27, %28 : vector<2x16x128xbf16>
    %30 = math.tanh %29 : vector<2x16x128xbf16>
    %31 = vector.broadcast %26 : vector<1x1x128xbf16> to vector<2x16x128xbf16>
    %32 = arith.mulf %30, %31 : vector<2x16x128xbf16>
    %33 = arith.extf %32 : vector<2x16x128xbf16> to vector<2x16x128xf32>
    %cst_10 = arith.constant dense<0.000000e+00> : vector<2x16xf32>
    %34 = vector.multi_reduction <add>, %33, %cst_10 [2] : vector<2x16x128xf32> to vector<2x16xf32>
    %35 = arith.addf %22, %34 : vector<2x16xf32>
    %36 = vector.extract_strided_slice %6 {offsets = [0, 256], sizes = [1, 128], strides = [1, 1]} : vector<1x512xbf16> to vector<1x128xbf16>
    %37 = vector.shape_cast %36 : vector<1x128xbf16> to vector<1x1x128xbf16>
    %38 = vector.extract_strided_slice %8 {offsets = [0, 256], sizes = [1, 128], strides = [1, 1]} : vector<1x512xbf16> to vector<1x128xbf16>
    %39 = vector.shape_cast %38 : vector<1x128xbf16> to vector<1x1x128xbf16>
    %c0_11 = arith.constant 0 : index
    %c0_12 = arith.constant 0 : index
    %c256 = arith.constant 256 : index
    %40 = vector.load %arg7[%c0_11, %c0_12, %c256] : memref<2x16x512xbf16, #tpu.memory_space<vmem>>, vector<2x16x128xbf16>
    %41 = vector.broadcast %37 : vector<1x1x128xbf16> to vector<2x16x128xbf16>
    %42 = arith.addf %40, %41 : vector<2x16x128xbf16>
    %43 = math.tanh %42 : vector<2x16x128xbf16>
    %44 = vector.broadcast %39 : vector<1x1x128xbf16> to vector<2x16x128xbf16>
    %45 = arith.mulf %43, %44 : vector<2x16x128xbf16>
    %46 = arith.extf %45 : vector<2x16x128xbf16> to vector<2x16x128xf32>
    %cst_13 = arith.constant dense<0.000000e+00> : vector<2x16xf32>
    %47 = vector.multi_reduction <add>, %46, %cst_13 [2] : vector<2x16x128xf32> to vector<2x16xf32>
    %48 = arith.addf %35, %47 : vector<2x16xf32>
    %49 = vector.extract_strided_slice %6 {offsets = [0, 384], sizes = [1, 128], strides = [1, 1]} : vector<1x512xbf16> to vector<1x128xbf16>
    %50 = vector.shape_cast %49 : vector<1x128xbf16> to vector<1x1x128xbf16>
    %51 = vector.extract_strided_slice %8 {offsets = [0, 384], sizes = [1, 128], strides = [1, 1]} : vector<1x512xbf16> to vector<1x128xbf16>
    %52 = vector.shape_cast %51 : vector<1x128xbf16> to vector<1x1x128xbf16>
    %c0_14 = arith.constant 0 : index
    %c0_15 = arith.constant 0 : index
    %c384 = arith.constant 384 : index
    %53 = vector.load %arg7[%c0_14, %c0_15, %c384] : memref<2x16x512xbf16, #tpu.memory_space<vmem>>, vector<2x16x128xbf16>
    %54 = vector.broadcast %50 : vector<1x1x128xbf16> to vector<2x16x128xbf16>
    %55 = arith.addf %53, %54 : vector<2x16x128xbf16>
    %56 = math.tanh %55 : vector<2x16x128xbf16>
    %57 = vector.broadcast %52 : vector<1x1x128xbf16> to vector<2x16x128xbf16>
    %58 = arith.mulf %56, %57 : vector<2x16x128xbf16>
    %59 = arith.extf %58 : vector<2x16x128xbf16> to vector<2x16x128xf32>
    %cst_16 = arith.constant dense<0.000000e+00> : vector<2x16xf32>
    %60 = vector.multi_reduction <add>, %59, %cst_16 [2] : vector<2x16x128xf32> to vector<2x16xf32>
    %61 = arith.addf %48, %60 : vector<2x16xf32>
    %cst_17 = arith.constant dense<0xFF800000> : vector<2xf32>
    %62 = vector.multi_reduction <maximumf>, %61, %cst_17 [1] : vector<2x16xf32> to vector<2xf32>
    %63 = vector.shape_cast %62 : vector<2xf32> to vector<2x1xf32>
    %64 = vector.broadcast %63 : vector<2x1xf32> to vector<2x16xf32>
    %65 = arith.subf %61, %64 : vector<2x16xf32>
    %66 = math.exp %65 : vector<2x16xf32>
    %cst_18 = arith.constant dense<0.000000e+00> : vector<2xf32>
    %67 = vector.multi_reduction <add>, %66, %cst_18 [1] : vector<2x16xf32> to vector<2xf32>
    %68 = vector.shape_cast %67 : vector<2xf32> to vector<2x1xf32>
    %69 = tpu.reciprocal %68 : vector<2x1xf32> -> vector<2x1xf32>
    %70 = vector.shape_cast %66 : vector<2x16xf32> to vector<2x1x16xf32>
    %c0_19 = arith.constant 0 : index
    %c0_20 = arith.constant 0 : index
    %c0_21 = arith.constant 0 : index
    %71 = vector.load %arg2[%c0_19, %c0_20, %c0_21] : memref<2x16x32xf32, #tpu.memory_space<vmem>>, vector<2x16x32xf32>
    "tpu.trace_start"() <{level = 10 : i32, message = "bqp,bpe->bqe"}> : () -> ()
    %cst_22 = arith.constant dense<0.000000e+00> : vector<2x1x32xf32>
    %72 = tpu.matmul %70, %71, %cst_22 {dimension_numbers = #tpu.dot_dimension_numbers<[2], [1], [1], [2], [0, 0, 0, 1, 1, 2], [0], [0]>} : vector<2x1x16xf32>, vector<2x16x32xf32>, vector<2x1x32xf32> -> vector<2x1x32xf32>
    "tpu.trace_stop"() : () -> ()
    %73 = vector.shape_cast %72 : vector<2x1x32xf32> to vector<2x32xf32>
    %74 = vector.broadcast %69 : vector<2x1xf32> to vector<2x32xf32>
    %75 = arith.mulf %73, %74 : vector<2x32xf32>
    %c0_23 = arith.constant 0 : index
    %c0_24 = arith.constant 0 : index
    %c0_25 = arith.constant 0 : index
    %76 = vector.load %arg6[%c0_23, %c0_24, %c0_25] : memref<1x2x32xf32, #tpu.memory_space<vmem>>, vector<1x2x32xf32>
    %77 = vector.shape_cast %76 : vector<1x2x32xf32> to vector<2x32xf32>
    %78 = vector.shape_cast %75 : vector<2x32xf32> to vector<1x2x32xf32>
    tpu.vector_store %arg6[%c0_23, %c0_24, %c0_25], %78 {strides = array<i32>} : memref<1x2x32xf32, #tpu.memory_space<vmem>>, vector<1x2x32xf32>,
    return
  }
  func.func @transform_0(%arg0: i32, %arg1: i32) -> (i32, i32, i32) {
    %c0_i32 = arith.constant 0 : i32
    %c0_i32_0 = arith.constant 0 : i32
    %c0_i32_1 = arith.constant 0 : i32
    return %arg0, %c0_i32, %c0_i32_0 : i32, i32, i32
  }
  func.func @transform_1(%arg0: i32, %arg1: i32) -> (i32, i32) {
    %c0_i32 = arith.constant 0 : i32
    %c0_i32_0 = arith.constant 0 : i32
    %c0_i32_1 = arith.constant 0 : i32
    return %c0_i32, %c0_i32_0 : i32, i32
  }
  func.func @transform_2(%arg0: i32, %arg1: i32) -> (i32, i32, i32) {
    %c0_i32 = arith.constant 0 : i32
    %c0_i32_0 = arith.constant 0 : i32
    %c0_i32_1 = arith.constant 0 : i32
    %c0_i32_2 = arith.constant 0 : i32
    return %c0_i32, %c0_i32_0, %c0_i32_1 : i32, i32, i32
  }
  func.func @transform_3(%arg0: i32, %arg1: i32) -> (i32, i32) {
    %c0_i32 = arith.constant 0 : i32
    %c0_i32_0 = arith.constant 0 : i32
    %c0_i32_1 = arith.constant 0 : i32
    return %c0_i32, %c0_i32_0 : i32, i32
  }
  func.func @transform_4(%arg0: i32, %arg1: i32) -> (i32, i32, i32) {
    %c0_i32 = arith.constant 0 : i32
    %c0_i32_0 = arith.constant 0 : i32
    return %arg1, %arg0, %c0_i32 : i32, i32, i32
  }
}

</mosaic_0001>

<bundles_post_ra>
// kernel: attention_forward.1
= control target key start
LH: loop header
LB: loop body
LE: loop exit
PB: predicated region body
PF: predicated region fallthrough
CT: control target
= control target key end

     0   :  { %9 = vsyncpa [#allocation4], 0  ;;  %s1463_s0 = inlined_call_operand.vmem [shape: f32[2,16,32], index: 0, kind: input, shape index: {}]   ;;  %s1464_s1 = inlined_call_operand.vmem [shape: bf16[32,512], index: 1, kind: input, shape index: {}]   ;;  %s1465_s2 = inlined_call_operand.vmem [shape: f32[2,1,512], index: 2, kind: input, shape index: {}]   ;;  %s1466_s3 = inlined_call_operand.vmem [shape: f32[1,512], index: 3, kind: input, shape index: {}]   ;;  %s1467_s4 = inlined_call_operand.hbm [shape: f32[2,2,32], index: 4, kind: output, shape index: {}]  }
   0x1   :  { %11 = vsyncpa [#allocation4 + $0x1], 0  ;;  %s1203_s15 = smov 0   ;;  %s1205_s16 = smov 0  }
   0x2   :  { %s1207_s17 = smov 0   ;;  %s1209_s18 = smov 0  }
   0x3   :  { %s1211_s19 = smov 0   ;;  %s1213_s20 = smov 0  }
   0x4 LB: > { %s932_s21 = sadd.s32 4294967295, %s1175_s20   ;;  %s933_s22 = sadd.s32 4294967294, %s1175_s20   ;;  %s1175_s20 = sphi %s1213_s20, %s17_s20   ;;  %s1171_s19 = sphi %s1211_s19, %s1474_s19   ;;  %s1167_s18 = sphi %s1209_s18, %s1473_s18   ;;  %s1163_s17 = sphi %s1207_s17, %s1472_s17   ;;  %s1159_s16 = sphi %s1205_s16, %s1471_s16   ;;  %s1155_s15 = sphi %s1203_s15, %s1470_s15  }
   0x5   : > { %s26_s23 = sadd.s32 1, %s1171_s19  ;;  %s127_s24 = sadd.s32 1, %s1163_s17 }
   0x6   : > { %p27_p0 = scmp.ge.s32.totalorder %s26_s23, 2  ;;  %p137_p1 = scmp.ne.s32.totalorder %s1163_s17, %s1159_s16 }
   0x7   : > { %p138_p2 = scmp.eq.s32.totalorder %s932_s21, 1  ;;  %p143_p3 = scmp.ne.s32.totalorder %s1159_s16, %s1155_s15 }
   0x8   : > { %s1476_s23 = smov (%p27_p0, %s26_s23), 0  ;;  %p144_p5 = scmp.eq.s32.totalorder %s933_s22, 1 }
   0x9   : > { %p1243_p4 = por %p138_p2, %p137_p1  ;;  %s122_s26 = ssub.s32 %s1171_s19, %s1476_s23 }
   0xa   : > { %p936_p6 = scmp.ge.s32.totalorder %s1175_s20, 1  ;;  %p125_p7 = scmp.eq.s32.totalorder %s122_s26, 0 }
   0xb   : > { %p1250_p8 = por %p144_p5, %p143_p3  ;;  %p181_p9 = scmp.lt.s32.totalorder %s1175_s20, 3 }
   0xc   : > { %s1256_s28 = scalar_select %p125_p7, %s1163_s17, %s127_s24  }
   0xd   : > { %p182_p10 = pnand %p936_p6, %p181_p9 }
   0xe   : > { %s205_s29 = sand.u32 (!%p182_p10), 1, %s1159_s16   ;;  %p938_p11 = scmp.ne.s32.totalorder (!%p182_p10), %s1167_s18, 0 }
   0xf   : > { %185 = sbr.rel (%p182_p10) target bundleno = 794 (0x31a), region = 36  ;;  %s1261_s30 = sshll.u32 (!%p182_p10), %s205_s29, 1 }
  0x10   : > { %s207_s5 = scalar_lea.vmem (!%p182_p10), [#allocation3], %s1261_s30 }
  0x14   : > { %219 = sbr.rel (%p938_p11) target bundleno = 196 (0xc4), region = 40 }
  0x19   : > { %v957_v0 = vld [vmem:[%s1464_s1 + $0x20] sm:$0xf]  ;;  %v994_v1 = vld [vmem:[%s1464_s1 + $0x2c] sm:$0xf0]  ;;  %v992_v2 = vld [vmem:[%s1464_s1 + $0x24] sm:$0xf] }
  0x1a   : > { %v958_v3 = vor.u32 %v994_v1, %v957_v0  ;;  %v959_v4 = vld [vmem:[%s1464_s1 + $0x30] sm:$0xf0]  ;;  %v965_v5 = vld [vmem:[%s1464_s1 + $0x28] sm:$0xf]  ;;  %v995_v6 = vld [vmem:[%s1464_s1 + $0x34] sm:$0xf0] }
  0x1b   : > { %v962_v7 = vor.u32 %v992_v2, %v959_v4  ;;  %v966_v8 = vor.u32 %v995_v6, %v965_v5  ;;  %v993_v9 = vld [vmem:[%s1464_s1 + $0x2c] sm:$0xf]  ;;  %v967_v10 = vld [vmem:[%s1464_s1 + $0x38] sm:$0xf0]  ;;  %v941_v11 = vld [vmem:[%s1464_s1] sm:$0xf] }
  0x1c   : > { %281 = vmatpush.bf16.msra.mxu0 %v958_v3  ;;  %v970_v12 = vor.u32 %v993_v9, %v967_v10  ;;  %v990_v13 = vld [vmem:[%s1464_s1 + $0xc] sm:$0xf0]  ;;  %v988_v14 = vld [vmem:[%s1464_s1 + $0x4] sm:$0xf]  ;;  %v943_v15 = vld [vmem:[%s1464_s1 + $0x10] sm:$0xf0] }
  0x1d   : > { %295 = vmatpush.bf16.msra.mxu1 %v962_v7  ;;  %309 = vmatpush.bf16.msra.mxu2 %v966_v8  ;;  %v942_v16 = vor.u32 %v990_v13, %v941_v11  ;;  %v946_v17 = vor.u32 %v988_v14, %v943_v15  ;;  %v949_v18 = vld [vmem:[%s1464_s1 + $0x8] sm:$0xf]  ;;  %v991_v19 = vld [vmem:[%s1464_s1 + $0x14] sm:$0xf0]  ;;  %v989_v20 = vld [vmem:[%s1464_s1 + $0xc] sm:$0xf] }
  0x1e   : > { %323 = vmatpush.bf16.msra.mxu3 %v970_v12  ;;  %v950_v21 = vor.u32 %v991_v19, %v949_v18  ;;  %v951_v22 = vld [vmem:[%s1464_s1 + $0x18] sm:$0xf0]  ;;  %v228_v23 = vld [vmem:[%s1463_s0] sm:$0xff]  ;;  %v229_v24 = vld [vmem:[%s1463_s0 + $0x8] sm:$0xff]  ;;  %vm271_vm0 = vcmask 261120  }
  0x1f   : > { %v954_v25 = vor.u32 %v989_v20, %v951_v22  ;;  %v230_v26 = vpack.c.bf16 %v229_v24, %v228_v23  ;;  %v975_v27 = vld [vmem:[%s1463_s0 + $0x10] sm:$0xff]  ;;  %v976_v28 = vld [vmem:[%s1463_s0 + $0x18] sm:$0xff] }
  0x20   : > { %282 = vmatpush.bf16.msra.mxu0 %v942_v16  ;;  %v342_v29 = vpack.c.bf16 %v976_v28, %v975_v27 }
  0x21   : > { %296 = vmatpush.bf16.msra.mxu1 %v946_v17  ;;  %310 = vmatpush.bf16.msra.mxu2 %v950_v21 }
  0x22   : > { %324 = vmatpush.bf16.msra.mxu3 %v954_v25 }
  0x23   : > { %971 = vmatmul.msk.bf16.vlgmr.msra.gmra.mxu0 %vm271_vm0, %v230_v26 }
  0x24   : > { %972 = vmatmul.msk.bf16.vlgmr.msra.gmra.mxu1 %vm271_vm0, %v230_v26  ;;  %973 = vmatmul.msk.bf16.vlgmr.msra.gmra.mxu2 %vm271_vm0, %v230_v26 }
  0x25   : > { %380 = vmatpush.bf16.msrb.mxu2 %v966_v8  ;;  %974 = vmatmul.msk.bf16.vlgmr.msra.gmra.mxu3 %vm271_vm0, %v230_v26 }
  0x26   : > { %394 = vmatpush.bf16.msrb.mxu3 %v970_v12  ;;  %352 = vmatpush.bf16.msrb.mxu0 %v958_v3 }
  0x27   : > { %366 = vmatpush.bf16.msrb.mxu1 %v962_v7 }
  0x29   : > { %381 = vmatpush.bf16.msrb.mxu2 %v950_v21 }
  0x2a   : > { %395 = vmatpush.bf16.msrb.mxu3 %v954_v25  ;;  %353 = vmatpush.bf16.msrb.mxu0 %v942_v16 }
  0x2b   : > { %367 = vmatpush.bf16.msrb.mxu1 %v946_v17 }
  0x33   : > { %977 = vmatmul.msk.bf16.vlgmr.msrb.gmra.mxu0 %vm271_vm0, %v342_v29 }
  0x34   : > { %978 = vmatmul.msk.bf16.vlgmr.msrb.gmra.mxu1 %vm271_vm0, %v342_v29  ;;  %979 = vmatmul.msk.bf16.vlgmr.msrb.gmra.mxu2 %vm271_vm0, %v342_v29 }
  0x35   : > { %980 = vmatmul.msk.bf16.vlgmr.msrb.gmra.mxu3 %vm271_vm0, %v342_v29 }
  0xa0   : > { %v284_v30 = vpop.f32.mrf.mxu0 }
  0xa1   : > { %v298_v31 = vpop.f32.mrf.mxu1 }
  0xa2   : > { %v331_v32 = vpack.c.bf16 %v298_v31, %v284_v30 }
  0xa4   : > { %335 = vst [vmem:[#allocation2] sm:$0xff] %v331_v32 }
  0xa7   : > { %v312_v33 = vpop.f32.mrf.mxu2 }
  0xa8   : > { %v326_v34 = vpop.f32.mrf.mxu3  ;;  %v286_v35 = vpop.f32.mrf.mxu0 }
  0xa9   : > { %v332_v36 = vpack.c.bf16 %v326_v34, %v312_v33  ;;  %v300_v37 = vpop.f32.mrf.mxu1 }
  0xaa   : > { %v333_v38 = vpack.c.bf16 %v300_v37, %v286_v35 }
  0xab   : > { %336 = vst [vmem:[#allocation2 + $0x8] sm:$0xff] %v332_v36 }
  0xac   : > { %337 = vst [vmem:[#allocation2 + $0x10] sm:$0xff] %v333_v38 }
  0xaf   : > { %v314_v39 = vpop.f32.mrf.mxu2 }
  0xb0   : > { %v328_v40 = vpop.f32.mrf.mxu3  ;;  %v355_v41 = vpop.f32.mrf.mxu0 }
  0xb1   : > { %v334_v42 = vpack.c.bf16 %v328_v40, %v314_v39  ;;  %v369_v43 = vpop.f32.mrf.mxu1 }
  0xb2   : > { %v402_v44 = vpack.c.bf16 %v369_v43, %v355_v41 }
  0xb3   : > { %338 = vst [vmem:[#allocation2 + $0x18] sm:$0xff] %v334_v42 }
  0xb4   : > { %407 = vst [vmem:[#allocation2 + $0x20] sm:$0xff] %v402_v44 }
  0xb7   : > { %v383_v45 = vpop.f32.mrf.mxu2 }
  0xb8   : > { %v397_v46 = vpop.f32.mrf.mxu3  ;;  %v357_v47 = vpop.f32.mrf.mxu0 }
  0xb9   : > { %v403_v48 = vpack.c.bf16 %v397_v46, %v383_v45  ;;  %v371_v49 = vpop.f32.mrf.mxu1 }
  0xba   : > { %v404_v50 = vpack.c.bf16 %v371_v49, %v357_v47 }
  0xbb   : > { %408 = vst [vmem:[#allocation2 + $0x28] sm:$0xff] %v403_v48 }
  0xbc   : > { %409 = vst [vmem:[#allocation2 + $0x30] sm:$0xff] %v404_v50 }
  0xbf   : > { %v385_v51 = vpop.f32.mrf.mxu2 }
  0xc0   : > { %v399_v52 = vpop.f32.mrf.mxu3 }
  0xc1   : > { %v405_v53 = vpack.c.bf16 %v399_v52, %v385_v51 }
  0xc3   : > { %410 = vst [vmem:[#allocation2 + $0x38] sm:$0xff] %v405_v53 }
  0xc4 PF: > { %s981_s7 = sshll.u32 %s1167_s18, 2  ;;  %v425_v54 = vld [vmem:[%s1466_s3] sm:$0xf]  ;;  %v1342_v63 = vld [vmem:[#allocation2 + $0x8] sm:$0xff]   ;;  %v1344_v1 = vld [vmem:[#allocation2 + $0x18] sm:$0xff]   ;;  %vm710_vm1 = vcmask 130112  }
  0xc5   : > { %s412_s12 = scalar_lea.vmem %s1465_s2, %s981_s7  ;;  %v429_v55 = vperm.slane %v425_v54, 2  ;;  %v430_v56 = vperm.slane %v425_v54, 3  ;;  %v427_v58 = vperm.slane %v425_v54, 0  ;;  %v428_v59 = vperm.slane %v425_v54, 1  ;;  %v1348_v4 = vld [vmem:[#allocation2 + $0x20] sm:$0xff]   ;;  %v1350_v6 = vld [vmem:[#allocation2 + $0x30] sm:$0xff]  }
  0xc6   : > { %v413_v57 = vld [vmem:[%s412_s12] sm:$0xf]  ;;  %v577_v7 = vunpack.c.l.bf16 %v1342_v63  ;;  %v1353_v10 = vld [vmem:[#allocation2 + $0x28] sm:$0xff]   ;;  %v578_v13 = vunpack.c.l.bf16 %v1344_v1  ;;  %v447_v15 = vunpack.c.l.bf16 %v1348_v4  ;;  %v438_v16 = vld [vmem:[#allocation2 + $0x10] sm:$0xff]   ;;  %v448_v18 = vunpack.c.l.bf16 %v1350_v6  ;;  %s985_s8 = sshll.u32 %s1167_s18, 1  ;;  %s856_s12 = sshll.u32 %s207_s5, 4  ;;  %s857_s12 = int_to_ptr.vmem [resolvable:$true] %s856_s12 }
  0xc7   : > { %v417_v60 = vperm.slane %v413_v57, 2  ;;  %v418_v61 = vperm.slane %v413_v57, 3  ;;  %v1340_v62 = vpack.c.bf16 %v430_v56, %v429_v55  ;;  %v415_v0 = vperm.slane %v413_v57, 0  ;;  %v437_v9 = vld [vmem:[#allocation2] sm:$0xff]   ;;  %s854_s11 = scalar_lea.hbm %s1467_s4, %s985_s8  ;;  %s843_s18 = scalar_lea.sflag [#allocation4], %s205_s29 }
  0xc8   : > { %v416_v2 = vperm.slane %v413_v57, 1  ;;  %v1346_v3 = vpack.c.bf16 %v428_v59, %v427_v58  ;;  %v445_v22 = vunpack.c.l.bf16 %v437_v9  ;;  %v579_v23 = vunpack.c.l.bf16 %v1353_v10  ;;  %s858_s13 = sshll.u32 %s854_s11, 4  ;;  %s1117_s26 = scalar_lea.hbm %s1467_s4, 4  ;;  %s859_s13 = int_to_ptr.hbm [resolvable:$true] %s858_s13 }
  0xc9   : > { %v424_v5 = vpack.c.bf16 %v418_v61, %v417_v60  ;;  %v603_v14 = vpack.i.b16 %v1340_v62, %v1340_v62  ;;  %v446_v26 = vunpack.c.l.bf16 %v438_v16  ;;  %v511_v31 = vunpack.c.h.bf16 %v437_v9  ;;  %s1111_s14 = sshra.s32 %s859_s13, 4  ;;  %s1112_s14 = int_to_ptr.hbm [resolvable:$true] %s1111_s14 }
  0xca   : > { %v423_v8 = vpack.c.bf16 %v416_v2, %v415_v0  ;;  %v1355_v11 = vld [vmem:[#allocation2 + $0x38] sm:$0xff]   ;;  %v471_v19 = vpack.i.b16 %v1346_v3, %v1346_v3  ;;  %v512_v32 = vunpack.c.h.bf16 %v438_v16  ;;  %v513_v55 = vunpack.c.h.bf16 %v1348_v4  ;;  %s1113_s21 = scalar_lea.hbm %s1112_s14, 2  ;;  %p1118_p1 = scmp.lt.s32.totalorder %s1112_s14, %s1467_s4 }
  0xcb   : > { %v574_v12 = vpack.i.b16 %v424_v5, %v424_v5  ;;  %v580_v24 = vunpack.c.l.bf16 %v1355_v11  ;;  %v638_v28 = vrot.slane %v424_v5, 4  ;;  %v605_v30 = vperm.slane %v603_v14, 0  ;;  %p1114_p12 = scmp.ne.s32.totalorder %s1112_s14, %s1113_s21  ;;  %p1119_p2 = scmp.lt.s32.totalorder %s1117_s26, %s1113_s21 }
  0xcc   : > { %v442_v17 = vpack.i.b16 %v423_v8, %v423_v8  ;;  %v506_v20 = vrot.slane %v423_v8, 4  ;;  %v1366_v34 = vperm.slane %v471_v19, 0  ;;  %v514_v56 = vunpack.c.h.bf16 %v1350_v6 }
  0xcd   : > { %v576_v21 = vperm.slane %v574_v12, 0  ;;  %v640_v36 = vpack.i.b16 %v638_v28, %v638_v28  ;;  %v537_v60 = vrot.slane %v1346_v3, 4  ;;  %v645_v8 = vunpack.c.h.bf16 %v1353_v10  ;;  %p1115_p13 = pnand %p1114_p12, %p1243_p4  ;;  %p1120_p3 = por %p1119_p2, %p1118_p1 }
  0xce   : > { %v444_v25 = vperm.slane %v442_v17, 0  ;;  %v508_v27 = vpack.i.b16 %v506_v20, %v506_v20  ;;  %v646_v4 = vunpack.c.h.bf16 %v1355_v11  ;;  %v478_v28 = vunpack.c.l.bf16 %v1366_v34 }
  0xcf   : > { %v581_v29 = vunpack.c.l.bf16 %v576_v21  ;;  %v642_v2 = vperm.slane %v640_v36, 0  ;;  %v539_v16 = vpack.i.b16 %v537_v60, %v537_v60  ;;  %vm715_vm2 = vcmask 1041409   ;;  %p1116_p0 = pneg %p1115_p13 }
  0xd0   : > { %v449_v33 = vunpack.c.l.bf16 %v444_v25  ;;  %v510_v35 = vperm.slane %v508_v27, 0  ;;  %vm718_vm3 = vcmask 123904   ;;  %vm784_vm4 = vcmask 130048  }
  0xd1   : > { %v582_v37 = vadd.f32 %v581_v29, %v577_v7  ;;  %v583_v38 = vadd.f32 %v581_v29, %v578_v13  ;;  %v584_v39 = vadd.f32 %v581_v29, %v579_v23  ;;  %v585_v40 = vadd.f32 %v581_v29, %v580_v24  ;;  %p1121_p5 = pnand %p1120_p3, %p1116_p0 }
  0xd2   : > { %v452_v41 = vadd.f32 %v449_v33, %v447_v15  ;;  %v453_v42 = vadd.f32 %v449_v33, %v448_v18  ;;  %v450_v43 = vadd.f32 %v449_v33, %v445_v22  ;;  %v451_v44 = vadd.f32 %v449_v33, %v446_v26 }
  0xd3   : > { %v586_v45 = vpack.c.bf16 %v582_v37, %v582_v37  ;;  %v587_v46 = vpack.c.bf16 %v583_v38, %v583_v38  ;;  %v588_v47 = vpack.c.bf16 %v584_v39, %v584_v39  ;;  %v589_v48 = vpack.c.bf16 %v585_v40, %v585_v40 }
  0xd4   : > { %v456_v49 = vpack.c.bf16 %v452_v41, %v452_v41  ;;  %v457_v50 = vpack.c.bf16 %v453_v42, %v453_v42  ;;  %v454_v51 = vpack.c.bf16 %v450_v43, %v450_v43  ;;  %v455_v52 = vpack.c.bf16 %v451_v44, %v451_v44 }
  0xd5   : > { %v590_v53 = vunpack.c.l.bf16 %v586_v45  ;;  %v591_v54 = vunpack.c.l.bf16 %v587_v46  ;;  %v592_v59 = vunpack.c.l.bf16 %v588_v47  ;;  %v515_v0 = vunpack.c.l.bf16 %v510_v35 }
  0xd6   : > { %v460_v57 = vunpack.c.l.bf16 %v456_v49  ;;  %v461_v58 = vunpack.c.l.bf16 %v457_v50  ;;  %v458_v61 = vunpack.c.l.bf16 %v454_v51  ;;  %v459_v5 = vunpack.c.l.bf16 %v455_v52 }
  0xd7   : > { %1055 = vtanh.f32 %v590_v53  ;;  %v593_v7 = vunpack.c.l.bf16 %v589_v48  ;;  %v516_v9 = vadd.f32 %v515_v0, %v511_v31  ;;  %v517_v12 = vadd.f32 %v515_v0, %v512_v32 }
  0xd8   : > { %1057 = vtanh.f32 %v591_v54  ;;  %v518_v6 = vadd.f32 %v515_v0, %v513_v55  ;;  %v519_v13 = vadd.f32 %v515_v0, %v514_v56  ;;  %v1373_v14 = vunpack.c.l.bf16 %v642_v2 }
  0xd9   : > { %1059 = vtanh.f32 %v460_v57  ;;  %v520_v3 = vpack.c.bf16 %v516_v9, %v516_v9  ;;  %v521_v15 = vpack.c.bf16 %v517_v12, %v517_v12  ;;  %v610_v24 = vunpack.c.l.bf16 %v605_v30 }
  0xda   : > { %1061 = vtanh.f32 %v461_v58  ;;  %v522_v17 = vpack.c.bf16 %v518_v6, %v518_v6  ;;  %v523_v18 = vpack.c.bf16 %v519_v13, %v519_v13  ;;  %v650_v19 = vadd.f32 %v1373_v14, %v645_v8 }
  0xdb   : > { %1063 = vtanh.f32 %v458_v61  ;;  %v524_v20 = vunpack.c.l.bf16 %v520_v3  ;;  %v525_v21 = vunpack.c.l.bf16 %v521_v15  ;;  %v651_v11 = vadd.f32 %v1373_v14, %v646_v4 }
  0xdc   : > { %1065 = vtanh.f32 %v459_v5  ;;  %v526_v25 = vunpack.c.l.bf16 %v522_v17  ;;  %v654_v29 = vpack.c.bf16 %v650_v19, %v650_v19  ;;  %v527_v35 = vunpack.c.l.bf16 %v523_v18 }
  0xdd   : > { %v1056_v10 = vpop.eup %1055  ;;  %1067 = vtanh.f32 %v592_v59  ;;  %v541_v39 = vperm.slane %v539_v16, 0  ;;  %v655_v40 = vpack.c.bf16 %v651_v11, %v651_v11  ;;  %vm840_vm9 = vcmask 254976  }
  0xde   : > { %v1058_v22 = vpop.eup %1057  ;;  %v598_v23 = vpack.c.bf16 %v1056_v10, %v1056_v10  ;;  %1069 = vtanh.f32 %v593_v7  ;;  %v658_v47 = vunpack.c.l.bf16 %v654_v29  ;;  %v643_v10 = vunpack.c.h.bf16 %v1342_v63 }
  0xdf   : > { %v1060_v26 = vpop.eup %1059  ;;  %v599_v27 = vpack.c.bf16 %v1058_v22, %v1058_v22  ;;  %1071 = vtanh.f32 %v524_v20  ;;  %v659_v61 = vunpack.c.l.bf16 %v655_v40  ;;  %v546_v4 = vunpack.c.l.bf16 %v541_v39 }
  0xe0   : > { %v1062_v31 = vpop.eup %1061  ;;  %v606_v32 = vunpack.c.l.bf16 %v598_v23  ;;  %v468_v33 = vpack.c.bf16 %v1060_v26, %v1060_v26  ;;  %1073 = vtanh.f32 %v525_v21  ;;  %v669_v22 = vrot.slane %v1340_v62, 4 }
  0xe1   : > { %v1064_v36 = vpop.eup %1063  ;;  %v607_v37 = vunpack.c.l.bf16 %v599_v27  ;;  %v469_v38 = vpack.c.bf16 %v1062_v31, %v1062_v31  ;;  %1075 = vtanh.f32 %v526_v25  ;;  %v648_v27 = vadd.f32 %v1373_v14, %v643_v10 }
  0xe2   : > { %v1066_v41 = vpop.eup %1065  ;;  %v611_v30 = vmul.f32 %v610_v24, %v606_v32  ;;  %v476_v42 = vunpack.c.l.bf16 %v468_v33  ;;  %v466_v43 = vpack.c.bf16 %v1064_v36, %v1064_v36  ;;  %1077 = vtanh.f32 %v527_v35 }
  0xe3   : > { %v1068_v44 = vpop.eup %1067  ;;  %v612_v45 = vmul.f32 %v610_v24, %v607_v37  ;;  %v477_v34 = vunpack.c.l.bf16 %v469_v38  ;;  %v467_v46 = vpack.c.bf16 %v1066_v41, %v1066_v41  ;;  %1079 = vtanh.f32 %v658_v47 }
  0xe4   : > { %v1070_v48 = vpop.eup %1069  ;;  %v481_v49 = vmul.f32 %v478_v28, %v476_v42  ;;  %v474_v50 = vunpack.c.l.bf16 %v466_v43  ;;  %v600_v51 = vpack.c.bf16 %v1068_v44, %v1068_v44  ;;  %1081 = vtanh.f32 %v659_v61 }
  0xe5   : > { %v1072_v52 = vpop.eup %1071  ;;  %v1378_v53 = vpack.c.bf16 %v612_v45, %v611_v30  ;;  %v482_v54 = vmul.f32 %v478_v28, %v477_v34  ;;  %v475_v55 = vunpack.c.l.bf16 %v467_v46  ;;  %v601_v56 = vpack.c.bf16 %v1070_v48, %v1070_v48 }
  0xe6   : > { %v1074_v57 = vpop.eup %1073  ;;  %v479_v58 = vmul.f32 %v478_v28, %v474_v50  ;;  %v608_v59 = vunpack.c.l.bf16 %v600_v51  ;;  %v532_v60 = vpack.c.bf16 %v1072_v52, %v1072_v52  ;;  %v671_v33 = vpack.i.b16 %v669_v22, %v669_v22 }
  0xe7   : > { %v617_v0 = vunpack.c.l.bf16 %v1378_v53  ;;  %v484_v2 = vpack.c.bf16 %v482_v54, %v481_v49  ;;  %v480_v5 = vmul.f32 %v478_v28, %v475_v55  ;;  %v609_v7 = vunpack.c.l.bf16 %v601_v56  ;;  %v1076_v8 = vpop.eup %1075 }
  0xe8   : > { %v613_v9 = vmul.f32 %v610_v24, %v608_v59  ;;  %v533_v12 = vpack.c.bf16 %v1074_v57, %v1074_v57  ;;  %v542_v15 = vunpack.c.l.bf16 %v532_v60  ;;  %v1078_v16 = vpop.eup %1077  ;;  %v534_v25 = vpack.c.bf16 %v1076_v8, %v1076_v8 }
  0xe9   : > { %621 = vadd.xlane.f32.xlu2 %v617_v0  ;;  %v487_v6 = vunpack.c.l.bf16 %v484_v2  ;;  %v483_v13 = vpack.c.bf16 %v480_v5, %v479_v58  ;;  %v614_v3 = vmul.f32 %v610_v24, %v609_v7  ;;  %v488_v23 = vunpack.c.h.bf16 %v484_v2  ;;  %v1080_v28 = vpop.eup %1079 }
  0xea   : > { %v543_v17 = vunpack.c.l.bf16 %v533_v12  ;;  %v547_v21 = vmul.f32 %v546_v4, %v542_v15  ;;  %v535_v26 = vpack.c.bf16 %v1078_v16, %v1078_v16  ;;  %v644_v24 = vunpack.c.h.bf16 %v1344_v1  ;;  %v1082_v31 = vpop.eup %1081 }
  0xeb   : > { %493 = vadd.xlane.f32.xlu1 %v487_v6  ;;  %v485_v18 = vunpack.c.l.bf16 %v483_v13  ;;  %v616_v19 = vpack.c.bf16 %v614_v3, %v613_v9  ;;  %v486_v29 = vunpack.c.h.bf16 %v483_v13  ;;  %v652_v35 = vpack.c.bf16 %v648_v27, %v648_v27 }
  0xec   : > { %v548_v11 = vmul.f32 %v546_v4, %v543_v17  ;;  %v649_v63 = vadd.f32 %v1373_v14, %v644_v24  ;;  %v544_v36 = vunpack.c.l.bf16 %v534_v25  ;;  %v545_v37 = vunpack.c.l.bf16 %v535_v26 }
  0xed   : > { %489 = vadd.xlane.f32.xlu0 %v485_v18  ;;  %v620_v20 = vunpack.c.h.bf16 %v616_v19  ;;  %v656_v38 = vunpack.c.l.bf16 %v652_v35  ;;  %v666_v39 = vpack.c.bf16 %v1080_v28, %v1080_v28  ;;  %v667_v40 = vpack.c.bf16 %v1082_v31, %v1082_v31 }
  0xee   : > { %v551_v32 = vpack.c.bf16 %v548_v11, %v547_v21  ;;  %v653_v62 = vpack.c.bf16 %v649_v63, %v649_v63  ;;  %v673_v41 = vperm.slane %v671_v33, 0  ;;  %v619_v42 = vunpack.c.l.bf16 %v616_v19 }
  0xef   : > { %1083 = vtanh.f32 %v656_v38  ;;  %v549_v43 = vmul.f32 %v546_v4, %v544_v36  ;;  %v550_v44 = vmul.f32 %v546_v4, %v545_v37  ;;  %v618_v14 = vunpack.c.h.bf16 %v1378_v53 }
  0xf0   : > { %v553_v1 = vunpack.c.l.bf16 %v551_v32  ;;  %v657_v30 = vunpack.c.l.bf16 %v653_v62  ;;  %v676_v45 = vunpack.c.l.bf16 %v666_v39  ;;  %v677_v34 = vunpack.c.l.bf16 %v667_v40 }
  0xf1   : > { %627 = vadd.xlane.f32.xlu2 %v620_v20  ;;  %v678_v46 = vunpack.c.l.bf16 %v673_v41  ;;  %v552_v48 = vpack.c.bf16 %v550_v44, %v549_v43  ;;  %v554_v51 = vunpack.c.h.bf16 %v551_v32  ;;  %v705_v20 = vlaneseq }
  0xf2   : > { %1085 = vtanh.f32 %v657_v30  ;;  %v1177_v44 = vmov 0  }
  0xf3   : > { %495 = vadd.xlane.f32.xlu1 %v488_v23  ;;  %v681_v52 = vmul.f32 %v678_v46, %v676_v45  ;;  %v682_v54 = vmul.f32 %v678_v46, %v677_v34  ;;  %v556_v57 = vunpack.c.h.bf16 %v552_v48  ;;  %v555_v60 = vunpack.c.l.bf16 %v552_v48  ;;  %1053 = vset.pattern.permute.xlu0 %v1177_v44 }
  0xf4   : > { %v1387_v25 = vand.u32 127, %v705_v20  ;;  %1054 = vset.pattern.permute.xlu1 %v1177_v44  ;;  %1052 = vset.pattern.permute.xlu2 %v1177_v44 }
  0xf5   : > { %491 = vadd.xlane.f32.xlu0 %v486_v29  ;;  %v1084_v47 = vpop.eup %1083  ;;  %v684_v53 = vpack.c.bf16 %v682_v54, %v681_v52 }
  0xf6   : > { %v664_v49 = vpack.c.bf16 %v1084_v47, %v1084_v47  ;;  %v1390_v32 = vadd.s32 4294967288, %v1387_v25 }
  0xf7   : > { %v687_v2 = vunpack.c.l.bf16 %v684_v53  ;;  %v688_v8 = vunpack.c.h.bf16 %v684_v53  ;;  %v780_v53 = vld [vmem:[%s1463_s0] sm:$0xff] }
  0xf8   : > { %v1086_v50 = vpop.eup %1085  ;;  %v674_v56 = vunpack.c.l.bf16 %v664_v49 }
  0xf9   : > { %557 = vadd.xlane.f32.xlu2 %v553_v1  ;;  %v665_v55 = vpack.c.bf16 %v1086_v50, %v1086_v50 }
  0xfa   : > { %v679_v59 = vmul.f32 %v678_v46, %v674_v56 }
  0xfb   : > { %625 = vadd.xlane.f32.xlu1 %v619_v42  ;;  %v675_v58 = vunpack.c.l.bf16 %v665_v55 }
  0xfd   : > { %623 = vadd.xlane.f32.xlu0 %v618_v14  ;;  %v680_v61 = vmul.f32 %v678_v46, %v675_v58 }
  0xff   : > { %v683_v0 = vpack.c.bf16 %v680_v61, %v679_v59  ;;  %v781_v59 = vld [vmem:[%s1463_s0 + $0x8] sm:$0xff]  ;;  %v782_v61 = vld [vmem:[%s1463_s0 + $0x10] sm:$0xff] }
 0x100   : > { %801 = vmatpush.msra.mxu0 %v781_v59 }
 0x101   : > { %559 = vadd.xlane.f32.xlu2 %v554_v51  ;;  %v686_v5 = vunpack.c.h.bf16 %v683_v0  ;;  %v685_v7 = vunpack.c.l.bf16 %v683_v0 }
 0x102   : > { %802 = vmatpush.msra.mxu0 %v780_v53 }
 0x103   : > { %563 = vadd.xlane.f32.xlu1 %v556_v57 }
 0x105   : > { %561 = vadd.xlane.f32.xlu0 %v555_v60  ;;  %v783_v60 = vld [vmem:[%s1463_s0 + $0x18] sm:$0xff] }
 0x106   : > { %823 = vmatpush.msra.mxu1 %v783_v60 }
 0x108   : > { %824 = vmatpush.msra.mxu1 %v782_v61 }
 0x109   : > { %693 = vadd.xlane.f32.xlu2 %v687_v2 }
 0x10b   : > { %691 = vadd.xlane.f32.xlu1 %v686_v5 }
 0x10d   : > { %689 = vadd.xlane.f32.xlu0 %v685_v7 }
 0x115   : > { %695 = vadd.xlane.f32.xlu0 %v688_v8 }
 0x15c   : > { %v622_v9 = vpop.xlane.xlu2 %621 }
 0x15e   : > { %v494_v12 = vpop.xlane.xlu1 %493 }
 0x160   : > { %v490_v4 = vpop.xlane.xlu0 %489 }
 0x164   : > { %v628_v6 = vpop.xlane.xlu2 %627 }
 0x166   : > { %v496_v13 = vpop.xlane.xlu1 %495 }
 0x168   : > { %v492_v3 = vpop.xlane.xlu0 %491 }
 0x16c   : > { %v558_v16 = vpop.xlane.xlu2 %557 }
 0x16d   : > { %v565_v21 = vadd.f32 %v558_v16, %v490_v4 }
 0x16e   : > { %v626_v15 = vpop.xlane.xlu1 %625 }
 0x16f   : > { %v629_v28 = vadd.f32 %v622_v9, %v565_v21 }
 0x170   : > { %v624_v17 = vpop.xlane.xlu0 %623 }
 0x174   : > { %v560_v10 = vpop.xlane.xlu2 %559 }
 0x175   : > { %v566_v11 = vadd.f32 %v560_v10, %v492_v3 }
 0x176   : > { %v564_v18 = vpop.xlane.xlu1 %563 }
 0x177   : > { %v568_v24 = vadd.f32 %v564_v18, %v496_v13  ;;  %v630_v27 = vadd.f32 %v624_v17, %v566_v11 }
 0x178   : > { %v562_v19 = vpop.xlane.xlu0 %561 }
 0x179   : > { %v567_v23 = vadd.f32 %v562_v19, %v494_v12  ;;  %v632_v36 = vadd.f32 %v628_v6, %v568_v24 }
 0x17b   : > { %v631_v31 = vadd.f32 %v626_v15, %v567_v23 }
 0x17c   : > { %v694_v29 = vpop.xlane.xlu2 %693 }
 0x17d   : > { %v699_v35 = vadd.f32 %v694_v29, %v631_v31 }
 0x17e   : > { %v692_v26 = vpop.xlane.xlu1 %691 }
 0x17f   : > { %v698_v33 = vadd.f32 %v692_v26, %v630_v27  ;;  %v712_v40 = vperm.slane %v699_v35, %v1387_v25 }
 0x180   : > { %v690_v22 = vpop.xlane.xlu0 %689 }
 0x181   : > { %v697_v63 = vadd.f32 %v690_v22, %v629_v28  ;;  %v709_v62 = vperm.slane %v698_v33, %v1390_v32 }
 0x183   : > { %v707_v38 = vperm.slane %v697_v63, %v1387_v25 }
 0x185   : > { %v711_v41 = vsel %vm710_vm1, %v709_v62, %v707_v38 }
 0x188   : > { %v696_v37 = vpop.xlane.xlu0 %695 }
 0x189   : > { %v700_v39 = vadd.f32 %v696_v37, %v632_v36 }
 0x18b   : > { %v713_v1 = vperm.slane %v700_v39, %v1390_v32 }
 0x18d   : > { %v714_v30 = vsel %vm710_vm1, %v713_v1, %v712_v40 }
 0x18e   : > { %v716_v42 = vsel %vm715_vm2, %v714_v30, %v711_v41 }
 0x18f   : > { %v719_v43 = vsel %vm718_vm3, %v716_v42, -inf }
 0x190   : > { %720 = vmax.xlane.f32.xlu1 %v719_v43 }
 0x203   : > { %v721_v14 = vpop.xlane.xlu1 %720 }
 0x204   : > { %v723_v45 = vperm.slane %v721_v14, 0  ;;  %v724_v34 = vperm.slane %v721_v14, 1 }
 0x206   : > { %v727_v46 = vsub.f32 %v697_v63, %v723_v45  ;;  %v729_v47 = vsub.f32 %v699_v35, %v724_v34  ;;  %v730_v48 = vsub.f32 %v700_v39, %v724_v34  ;;  %v728_v52 = vsub.f32 %v698_v33, %v723_v45 }
 0x208   : > { %v731_v49 = vmul.f32 1.442695, %v727_v46  ;;  %v735_v50 = vmul.f32 1.442695, %v729_v47  ;;  %v737_v51 = vmul.f32 1.442695, %v730_v48 }
 0x209   : > { %v733_v55 = vmul.f32 1.442695, %v728_v52 }
 0x20a   : > { %1087 = vpow2.f32 %v731_v49 }
 0x20b   : > { %1089 = vpow2.f32 %v735_v50 }
 0x20c   : > { %1091 = vpow2.f32 %v737_v51 }
 0x20d   : > { %1093 = vpow2.f32 %v733_v55 }
 0x210   : > { %v1088_v54 = vpop.eup %1087 }
 0x211   : > { %744 = vperm.xlu1 %1054, %v1088_v54   ;;  %v1090_v56 = vpop.eup %1089 }
 0x212   : > { %v1092_v57 = vpop.eup %1091  ;;  %750 = vperm.xlu2 %1052, %v1090_v56  }
 0x213   : > { %753 = vperm.xlu0 %1053, %v1092_v57   ;;  %v1094_v58 = vpop.eup %1093 }
 0x21a   : > { %747 = vperm.xlu2 %1052, %v1094_v58  }
 0x26c   : > { %v751_v0 = vpop.permute.xlu2 %750 }
 0x26d   : > { %v758_v4 = vperm.slane %v751_v0, %v1387_v25 }
 0x274   : > { %v748_v2 = vpop.permute.xlu2 %747 }
 0x275   : > { %v756_v7 = vperm.slane %v748_v2, %v1390_v32 }
 0x283   : > { %v745_v5 = vpop.permute.xlu1 %744 }
 0x284   : > { %v755_v8 = vperm.slane %v745_v5, %v1387_v25 }
 0x285   : > { %v754_v9 = vpop.permute.xlu0 %753 }
 0x286   : > { %v757_v12 = vsel %vm710_vm1, %v756_v7, %v755_v8  ;;  %v759_v6 = vperm.slane %v754_v9, %v1390_v32 }
 0x287   : > { %982 = vmatmul.msk.f32.vlgmr.msra.gmra.mxu0 %vm784_vm4, %v757_v12 }
 0x288   : > { %v760_v13 = vsel %vm710_vm1, %v759_v6, %v758_v4 }
 0x289   : > { %983 = vmatmul.msk.f32.vlgmr.msra.gmra.mxu1 %vm784_vm4, %v760_v13  ;;  %v761_v3 = vsel %vm715_vm2, %v760_v13, %v757_v12 }
 0x28a   : > { %v763_v15 = vsel %vm718_vm3, %v761_v3, 0.0 }
 0x28b   : > { %764 = vadd.xlane.f32.xlu2 %v763_v15 }
 0x2fe   : > { %v765_v16 = vpop.xlane.xlu2 %764 }
 0x2ff   : > { %1095 = vrcp.f32 %v765_v16  ;;  %v777_v10 = vand.u32 2147483648, %v765_v16  ;;  %v775_v21 = vand.u32 2147483647, %v765_v16  ;;  %vm771_vm6 = vweird.f32 %v765_v16 }
 0x301   : > { %v778_v22 = vor.u32 1.1754944e-38, %v777_v10  ;;  %vm776_vm8 = vcmp.eq.f32.partialorder %v775_v21, 8.507059e+37 }
 0x304   : > { %v804_v28 = vpop.f32.mrf.mxu0 }
 0x305   : > { %v1096_v17 = vpop.eup %1095 }
 0x306   : > { %v767_v18 = vmul.f32 %v1096_v17, %v765_v16  ;;  %vm772_vm5 = vweird.f32 %v1096_v17  ;;  %v826_v24 = vpop.f32.mrf.mxu1 }
 0x307   : > { %vm773_vm7 = vmor %vm771_vm6, %vm772_vm5 }
 0x308   : > { %v768_v19 = vsub.f32 1.0, %v767_v18 }
 0x30a   : > { %v769_v20 = vmul.f32 %v1096_v17, %v768_v19 }
 0x30c   : > { %v770_v11 = vadd.f32 %v1096_v17, %v769_v20 }
 0x30e   : > { %v774_v23 = vsel %vm773_vm7, %v1096_v17, %v770_v11 }
 0x30f   : > { %v779_v25 = vsel %vm776_vm8, %v778_v22, %v774_v23 }
 0x310   : > { %v830_v26 = vrot.slane %v779_v25, 1  ;;  %v833_v29 = vmul.f32 %v804_v28, %v779_v25 }
 0x312   : > { %v834_v27 = vmul.f32 %v830_v26, %v826_v24 }
 0x314   : > { %v837_v31 = vrot.slane %v834_v27, 7 }
 0x316   : > { %v838_v32 = vsel %vm715_vm2, %v837_v31, %v833_v29 }
 0x317   : > { %841 = vst.msk [vmem:[%s207_s5] sm:$0x3] %vm840_vm9, %v838_v32 }
 0x318   : > { %1124 = shalt.err (!%p1121_p5)
}
 0x319   : > { %996 = dma.vmem_to_hbm [thread:$0]  (%p1243_p4), %s857_s12, 32, %s859_s13, %s843_s18  }
 0x31a PF: > { %p1002_p6 = scmp.ge.s32.totalorder %s1175_s20, 2  ;;  %s870_s29 = sand.u32 1, %s1155_s15  }
 0x31b   : > { %s871_s30 = scalar_lea.sflag [#allocation4], %s870_s29 }
 0x31c   : > { %p999_p7 = pnand %p1002_p6, %p1250_p8 }
 0x31e   : > { %p1000_p9 = pneg %p999_p7 }
 0x320   : > { %1150 = dma.done.wait (%p1000_p9), %s871_s30, 32  }
 0x321   : > { %1152 = vsyncadd (%p1000_p9), %s871_s30, 4294967264  ;;  %s17_s20 = sadd.s32 1, %s1175_s20   ;;  %s1470_s15 = smov %s1159_s16 }
 0x322   : > { %p14_p10 = scmp.ge.s32.totalorder %s17_s20, 4   ;;  %s1471_s16 = smov %s1163_s17 }
 0x323   : > { %s1472_s17 = smov %s1256_s28  ;;  %s1473_s18 = smov %s1171_s19 }
 0x324   : > { %s1474_s19 = smov %s1476_s23  ;;  %16 = sbr.rel (!%p14_p10) target bundleno = 4 (0x4), region = 78 }
 0x329   :  { %877 = vsyncpa [#allocation4], 1 }
 0x32a   :  { %879 = vsyncpa [#allocation4 + $0x1], 1 }

</bundles_post_ra>
